<compile_context>
chip_gen: v6e
topology: v6e:2x2x1
jax: 0.10.0
libtpu: 0.0.40
codegen_flags: <defaults>
</compile_context>

<pallas_src>
import functools

import jax
import jax.numpy as jnp
from jax.experimental import pallas as pl
from jax.experimental.pallas import tpu as pltpu


# ---------------------------------------------------------------------------
# Kernel 1: lane-dense conv matmul (bf16 MXU, f32 acc) + per-channel sum/sumsq
# ---------------------------------------------------------------------------
def _conv_stats_kernel(w_ref, p_ref, out_ref, sum_ref, sumsq_ref):
    m = pl.program_id(0)

    @pl.when(m == 0)
    def _():
        sum_ref[...] = jnp.zeros_like(sum_ref)
        sumsq_ref[...] = jnp.zeros_like(sumsq_ref)

    acc = jnp.dot(w_ref[...], p_ref[...], preferred_element_type=jnp.float32)  # (OC, tm)
    out_ref[...] = acc
    # Zero-padded M columns of the patch matrix give exactly-zero conv columns
    # (bias=False), so they contribute nothing to sum / sumsq.
    sum_ref[...] += jnp.sum(acc, axis=1, keepdims=True)
    sumsq_ref[...] += jnp.sum(acc * acc, axis=1, keepdims=True)


# ---------------------------------------------------------------------------
# Kernel 2: fused BatchNorm affine + LeakyReLU(0.1) (in-place on conv output)
# ---------------------------------------------------------------------------
def _bn_lrelu_kernel(x_ref, scale_ref, shift_ref, o_ref):
    y = x_ref[...] * scale_ref[...] + shift_ref[...]
    o_ref[...] = jnp.where(y >= 0, y, 0.1 * y)


# ---------------------------------------------------------------------------
# Wrapper
# ---------------------------------------------------------------------------
@functools.partial(jax.jit, static_argnames=("stride", "padding"))
def darknet_conv_forward(x, weight, gamma, beta, *, stride=1, padding=0, eps=1e-5):
    """x: (N, C, H, W) float32; weight: (OC, C, KH, KW); gamma/beta: (OC,)."""
    N, C, H, W = x.shape
    OC, _, KH, KW = weight.shape
    OH = (H + 2 * padding - KH) // stride + 1
    OW = (W + 2 * padding - KW) // stride + 1
    M = N * OH * OW
    K = C * KH * KW

    # -------- patch matrix, built directly as (K, M) in bf16 --------
    xp = jnp.pad(x, ((0, 0), (0, 0), (padding, padding), (padding, padding)))
    xc = xp.transpose(1, 0, 2, 3).astype(jnp.bfloat16)  # (C, N, Hp, Wp), 1x-sized transpose
    cols = []
    for kh in range(KH):
        for kw in range(KW):
            cols.append(
                xc[:, :, kh : kh + stride * OH : stride, kw : kw + stride * OW : stride]
            )  # (C, N, OH, OW)
    # (C, KH*KW, N, OH, OW) -> (K, M): adjacent-axis merges only, no extra transpose.
    patches_t = jnp.stack(cols, axis=1).reshape(K, M)
    # TODO(synk): fully fuse patch extraction into the matmul kernel (halo'd input DMA
    # per output-row slab) so the K x M patch matrix is never materialized in HBM.

    w2 = weight.reshape(OC, K).astype(jnp.bfloat16)  # (OC, K); K ordering matches patches

    # -------- tiling: M on the lane axis, large lane-dense tiles --------
    def round_up(a, b):
        return -(-a // b) * b

    # Cap tm so the double-buffered bf16 (K, tm) patch tile stays well inside scoped VMEM
    # (re-derived for the smaller v7x VMEM / v5e 16 MiB scoped default).
    max_tm_vmem = max(512, ((8 * 1024 * 1024) // max(1, 2 * K)) // 128 * 128)
    tm = min(2048, max_tm_vmem, round_up(M, 512))
    m_pad = round_up(M, tm)
    mt = m_pad // tm
    if m_pad != M:
        patches_t = jnp.pad(patches_t, ((0, 0), (0, m_pad - M)))

    # -------- kernel 1: conv matmul + per-channel stats --------
    conv_out, ch_sum, ch_sumsq = pl.pallas_call(
        _conv_stats_kernel,
        out_shape=(
            jax.ShapeDtypeStruct((OC, m_pad), jnp.float32),
            jax.ShapeDtypeStruct((OC, 1), jnp.float32),
            jax.ShapeDtypeStruct((OC, 1), jnp.float32),
        ),
        grid_spec=pltpu.PrefetchScalarGridSpec(
            num_scalar_prefetch=0,
            grid=(mt,),
            in_specs=[
                pl.BlockSpec((OC, K), lambda m: (0, 0)),   # weights, resident
                pl.BlockSpec((K, tm), lambda m: (0, m)),   # streamed bf16 patch tiles
            ],
            out_specs=[
                pl.BlockSpec((OC, tm), lambda m: (0, m)),  # lane-dense conv tile
                pl.BlockSpec((OC, 1), lambda m: (0, 0)),   # resident stats accumulators
                pl.BlockSpec((OC, 1), lambda m: (0, 0)),
            ],
        ),
        compiler_params=pltpu.CompilerParams(
            # TODO(synk): on v7x emit per-m-block stat partials (reduced in the wrapper)
            # so this axis can be marked "parallel" across the two TensorCores.
            dimension_semantics=("arbitrary",),
            vmem_limit_bytes=32 * 1024 * 1024,
        ),
    )(w2, patches_t)

    # -------- BN statistics (training mode: biased batch variance) --------
    cnt = jnp.float32(M)
    mean = ch_sum[:, 0] / cnt
    var = jnp.maximum(ch_sumsq[:, 0] / cnt - mean * mean, 0.0)
    scale = gamma.astype(jnp.float32) / jnp.sqrt(var + eps)
    shift = beta.astype(jnp.float32) - mean * scale

    # -------- kernel 2: BN affine + LeakyReLU(0.1), aliased in-place --------
    y = pl.pallas_call(
        _bn_lrelu_kernel,
        out_shape=jax.ShapeDtypeStruct((OC, m_pad), jnp.float32),
        grid_spec=pltpu.PrefetchScalarGridSpec(
            num_scalar_prefetch=0,
            grid=(mt,),
            in_specs=[
                pl.BlockSpec((OC, tm), lambda m: (0, m)),
                pl.BlockSpec((OC, 1), lambda m: (0, 0)),
                pl.BlockSpec((OC, 1), lambda m: (0, 0)),
            ],
            out_specs=pl.BlockSpec((OC, tm), lambda m: (0, m)),
        ),
        input_output_aliases={0: 0},
        compiler_params=pltpu.CompilerParams(
            dimension_semantics=("parallel",),
            vmem_limit_bytes=32 * 1024 * 1024,
        ),
    )(conv_out, scale.reshape(OC, 1), shift.reshape(OC, 1))

    # -------- back to NCHW --------
    # TODO(synk): if the downstream consumer accepts the (OC, N, OH, OW) layout, drop
    # this final XLA transpose (it is a full HBM round trip outside the kernels).
    y = y[:, :M].reshape(OC, N, OH, OW).transpose(1, 0, 2, 3)
    return y


if __name__ == "__main__":
    # DarknetConv(in_filters=4, out_filters=8, size=3, stride=1, padding=1)
    N, C, H, W = 2, 4, 16, 16
    OC, KH, KW = 8, 3, 3
    stride, padding = 1, 1

    key = jax.random.PRNGKey(0)
    kx, kw, kg, kb = jax.random.split(key, 4)
    x = jax.random.normal(kx, (N, C, H, W), dtype=jnp.float32)
    weight = 0.1 * jax.random.normal(kw, (OC, C, KH, KW), dtype=jnp.float32)
    gamma = 1.0 + 0.1 * jax.random.normal(kg, (OC,), dtype=jnp.float32)
    beta = 0.1 * jax.random.normal(kb, (OC,), dtype=jnp.float32)

    out = darknet_conv_forward(x, weight, gamma, beta, stride=stride, padding=padding)
    jax.block_until_ready(out)
    assert out.shape == (N, OC, H, W), out.shape
    print("KERNEL_OK")
</pallas_src>

<mosaic_0001>
module attributes {stable_mosaic.version = 11 : i64} {
  func.func @_conv_stats_kernel(%arg0: i32, %arg1: memref<8x36xbf16, #tpu.memory_space<vmem>>, %arg2: memref<36x512xbf16, #tpu.memory_space<vmem>>, %arg3: memref<8x512xf32, #tpu.memory_space<vmem>>, %arg4: memref<8x1xf32, #tpu.memory_space<vmem>>, %arg5: memref<8x1xf32, #tpu.memory_space<vmem>>) attributes {dimension_semantics = [#tpu.dimension_semantics<arbitrary>], iteration_bounds = array<i64: 1>, scalar_prefetch = 0 : i64, scratch_operands = 0 : i64, tpu.core_type = #tpu.core_type<tc>, window_params = [{pipeline_mode = #tpu.pipeline_mode<synchronous>, transform_indices = @transform_0, window_bounds = array<i64: 8, 36>}, {transform_indices = @transform_1, window_bounds = array<i64: 36, 512>}, {transform_indices = @transform_2, window_bounds = array<i64: 8, 512>}, {pipeline_mode = #tpu.pipeline_mode<synchronous>, transform_indices = @transform_3, window_bounds = array<i64: 8, 1>}, {pipeline_mode = #tpu.pipeline_mode<synchronous>, transform_indices = @transform_4, window_bounds = array<i64: 8, 1>}]} {
    %c0_i32 = arith.constant 0 : i32
    %0 = arith.cmpi eq, %arg0, %c0_i32 : i32
    %1 = arith.extui %0 : i1 to i32
    %c0_i32_0 = arith.constant 0 : i32
    %2 = arith.cmpi ne, %1, %c0_i32_0 : i32
    scf.if %2 {
      %cst_16 = arith.constant 0.000000e+00 : f32
      %18 = vector.broadcast %cst_16 : f32 to vector<8x1xf32>
      %c0_17 = arith.constant 0 : index
      %c0_18 = arith.constant 0 : index
      %19 = vector.load %arg4[%c0_17, %c0_18] : memref<8x1xf32, #tpu.memory_space<vmem>>, vector<8x1xf32>
      tpu.vector_store %arg4[%c0_17, %c0_18], %18 {strides = array<i32>} : memref<8x1xf32, #tpu.memory_space<vmem>>, vector<8x1xf32>,
      %cst_19 = arith.constant 0.000000e+00 : f32
      %20 = vector.broadcast %cst_19 : f32 to vector<8x1xf32>
      %c0_20 = arith.constant 0 : index
      %c0_21 = arith.constant 0 : index
      %21 = vector.load %arg5[%c0_20, %c0_21] : memref<8x1xf32, #tpu.memory_space<vmem>>, vector<8x1xf32>
      tpu.vector_store %arg5[%c0_20, %c0_21], %20 {strides = array<i32>} : memref<8x1xf32, #tpu.memory_space<vmem>>, vector<8x1xf32>,
    } else {
    }
    %c0 = arith.constant 0 : index
    %c0_1 = arith.constant 0 : index
    %3 = vector.load %arg1[%c0, %c0_1] : memref<8x36xbf16, #tpu.memory_space<vmem>>, vector<8x36xbf16>
    %c0_2 = arith.constant 0 : index
    %c0_3 = arith.constant 0 : index
    %4 = vector.load %arg2[%c0_2, %c0_3] : memref<36x512xbf16, #tpu.memory_space<vmem>>, vector<36x512xbf16>
    %cst = arith.constant dense<0.000000e+00> : vector<8x512xf32>
    %5 = tpu.matmul %3, %4, %cst {dimension_numbers = #tpu.dot_dimension_numbers<[1], [0], [0], [1], [0, 0, 1, 1], [], []>} : vector<8x36xbf16>, vector<36x512xbf16>, vector<8x512xf32> -> vector<8x512xf32>
    %c0_4 = arith.constant 0 : index
    %c0_5 = arith.constant 0 : index
    %6 = vector.load %arg3[%c0_4, %c0_5] : memref<8x512xf32, #tpu.memory_space<vmem>>, vector<8x512xf32>
    tpu.vector_store %arg3[%c0_4, %c0_5], %5 {strides = array<i32>} : memref<8x512xf32, #tpu.memory_space<vmem>>, vector<8x512xf32>,
    %c0_6 = arith.constant 0 : index
    %c0_7 = arith.constant 0 : index
    %7 = vector.load %arg4[%c0_6, %c0_7] : memref<8x1xf32, #tpu.memory_space<vmem>>, vector<8x1xf32>
    %cst_8 = arith.constant dense<0.000000e+00> : vector<8xf32>
    %8 = vector.multi_reduction <add>, %5, %cst_8 [1] : vector<8x512xf32> to vector<8xf32>
    %9 = vector.shape_cast %8 : vector<8xf32> to vector<8x1xf32>
    %10 = arith.addf %7, %9 : vector<8x1xf32>
    %c0_9 = arith.constant 0 : index
    %c0_10 = arith.constant 0 : index
    %11 = vector.load %arg4[%c0_9, %c0_10] : memref<8x1xf32, #tpu.memory_space<vmem>>, vector<8x1xf32>
    tpu.vector_store %arg4[%c0_9, %c0_10], %10 {strides = array<i32>} : memref<8x1xf32, #tpu.memory_space<vmem>>, vector<8x1xf32>,
    %c0_11 = arith.constant 0 : index
    %c0_12 = arith.constant 0 : index
    %12 = vector.load %arg5[%c0_11, %c0_12] : memref<8x1xf32, #tpu.memory_space<vmem>>, vector<8x1xf32>
    %13 = arith.mulf %5, %5 : vector<8x512xf32>
    %cst_13 = arith.constant dense<0.000000e+00> : vector<8xf32>
    %14 = vector.multi_reduction <add>, %13, %cst_13 [1] : vector<8x512xf32> to vector<8xf32>
    %15 = vector.shape_cast %14 : vector<8xf32> to vector<8x1xf32>
    %16 = arith.addf %12, %15 : vector<8x1xf32>
    %c0_14 = arith.constant 0 : index
    %c0_15 = arith.constant 0 : index
    %17 = vector.load %arg5[%c0_14, %c0_15] : memref<8x1xf32, #tpu.memory_space<vmem>>, vector<8x1xf32>
    tpu.vector_store %arg5[%c0_14, %c0_15], %16 {strides = array<i32>} : memref<8x1xf32, #tpu.memory_space<vmem>>, vector<8x1xf32>,
    return
  }
  func.func @transform_0(%arg0: i32) -> (i32, i32) {
    %c0_i32 = arith.constant 0 : i32
    %c0_i32_0 = arith.constant 0 : i32
    %c0_i32_1 = arith.constant 0 : i32
    return %c0_i32, %c0_i32_0 : i32, i32
  }
  func.func @transform_1(%arg0: i32) -> (i32, i32) {
    %c0_i32 = arith.constant 0 : i32
    %c0_i32_0 = arith.constant 0 : i32
    return %c0_i32, %arg0 : i32, i32
  }
  func.func @transform_2(%arg0: i32) -> (i32, i32) {
    %c0_i32 = arith.constant 0 : i32
    %c0_i32_0 = arith.constant 0 : i32
    return %c0_i32, %arg0 : i32, i32
  }
  func.func @transform_3(%arg0: i32) -> (i32, i32) {
    %c0_i32 = arith.constant 0 : i32
    %c0_i32_0 = arith.constant 0 : i32
    %c0_i32_1 = arith.constant 0 : i32
    return %c0_i32, %c0_i32_0 : i32, i32
  }
  func.func @transform_4(%arg0: i32) -> (i32, i32) {
    %c0_i32 = arith.constant 0 : i32
    %c0_i32_0 = arith.constant 0 : i32
    %c0_i32_1 = arith.constant 0 : i32
    return %c0_i32, %c0_i32_0 : i32, i32
  }
}

module attributes {stable_mosaic.version = 11 : i64} {
  func.func @_bn_lrelu_kernel(%arg0: i32, %arg1: memref<8x512xf32, #tpu.memory_space<vmem>>, %arg2: memref<8x1xf32, #tpu.memory_space<vmem>>, %arg3: memref<8x1xf32, #tpu.memory_space<vmem>>, %arg4: memref<8x512xf32, #tpu.memory_space<vmem>>) attributes {dimension_semantics = [#tpu.dimension_semantics<parallel>], iteration_bounds = array<i64: 1>, scalar_prefetch = 0 : i64, scratch_operands = 0 : i64, tpu.core_type = #tpu.core_type<tc>, window_params = [{transform_indices = @transform_0, window_bounds = array<i64: 8, 512>}, {pipeline_mode = #tpu.pipeline_mode<synchronous>, transform_indices = @transform_1, window_bounds = array<i64: 8, 1>}, {pipeline_mode = #tpu.pipeline_mode<synchronous>, transform_indices = @transform_2, window_bounds = array<i64: 8, 1>}, {transform_indices = @transform_3, window_bounds = array<i64: 8, 512>}]} {
    %c0 = arith.constant 0 : index
    %c0_0 = arith.constant 0 : index
    %0 = vector.load %arg1[%c0, %c0_0] : memref<8x512xf32, #tpu.memory_space<vmem>>, vector<8x512xf32>
    %c0_1 = arith.constant 0 : index
    %c0_2 = arith.constant 0 : index
    %1 = vector.load %arg2[%c0_1, %c0_2] : memref<8x1xf32, #tpu.memory_space<vmem>>, vector<8x1xf32>
    %2 = vector.broadcast %1 : vector<8x1xf32> to vector<8x512xf32>
    %3 = arith.mulf %0, %2 : vector<8x512xf32>
    %c0_3 = arith.constant 0 : index
    %c0_4 = arith.constant 0 : index
    %4 = vector.load %arg3[%c0_3, %c0_4] : memref<8x1xf32, #tpu.memory_space<vmem>>, vector<8x1xf32>
    %5 = vector.broadcast %4 : vector<8x1xf32> to vector<8x512xf32>
    %6 = arith.addf %3, %5 : vector<8x512xf32>
    %cst = arith.constant 0.000000e+00 : f32
    %7 = vector.broadcast %cst : f32 to vector<8x512xf32>
    %8 = arith.cmpf oge, %6, %7 : vector<8x512xf32>
    %cst_5 = arith.constant 1.000000e-01 : f32
    %9 = vector.broadcast %cst_5 : f32 to vector<8x512xf32>
    %10 = arith.mulf %9, %6 : vector<8x512xf32>
    %11 = arith.select %8, %6, %10 : vector<8x512xi1>, vector<8x512xf32>
    %c0_6 = arith.constant 0 : index
    %c0_7 = arith.constant 0 : index
    %12 = vector.load %arg4[%c0_6, %c0_7] : memref<8x512xf32, #tpu.memory_space<vmem>>, vector<8x512xf32>
    tpu.vector_store %arg4[%c0_6, %c0_7], %11 {strides = array<i32>} : memref<8x512xf32, #tpu.memory_space<vmem>>, vector<8x512xf32>,
    return
  }
  func.func @transform_0(%arg0: i32) -> (i32, i32) {
    %c0_i32 = arith.constant 0 : i32
    %c0_i32_0 = arith.constant 0 : i32
    return %c0_i32, %arg0 : i32, i32
  }
  func.func @transform_1(%arg0: i32) -> (i32, i32) {
    %c0_i32 = arith.constant 0 : i32
    %c0_i32_0 = arith.constant 0 : i32
    %c0_i32_1 = arith.constant 0 : i32
    return %c0_i32, %c0_i32_0 : i32, i32
  }
  func.func @transform_2(%arg0: i32) -> (i32, i32) {
    %c0_i32 = arith.constant 0 : i32
    %c0_i32_0 = arith.constant 0 : i32
    %c0_i32_1 = arith.constant 0 : i32
    return %c0_i32, %c0_i32_0 : i32, i32
  }
  func.func @transform_3(%arg0: i32) -> (i32, i32) {
    %c0_i32 = arith.constant 0 : i32
    %c0_i32_0 = arith.constant 0 : i32
    return %c0_i32, %arg0 : i32, i32
  }
}

</mosaic_0001>

<bundles_post_ra>
// kernel: darknet_conv_forward.3
= control target key start
LH: loop header
LB: loop body
LE: loop exit
PB: predicated region body
PF: predicated region fallthrough
CT: control target
= control target key end

     0   :  { %v60_v0 = vmov 0   ;;  %s111_s1 = inlined_call_operand.vmem [shape: f32[8,1], index: 1, kind: input, shape index: {}]   ;;  %s112_s2 = inlined_call_operand.vmem [shape: f32[8,1], index: 2, kind: input, shape index: {}]   ;;  %s113_s0 = inlined_call_operand.vmem [shape: f32[8,512], index: 0, kind: input, shape index: {}, may-alias: {0,3}]   ;;  %s114_s3 = inlined_call_operand.vmem [shape: f32[8,512], index: 3, kind: output, shape index: {}, may-alias: {0,3}]  }
   0x1   :  { %59 = vset.pattern.permute.xlu0 %v60_v0  ;;  %v18_v1 = vld [vmem:[%s111_s1] sm:$0xff]  ;;  %v15_v5 = vld [vmem:[%s113_s0 + $0x8] sm:$0xff]  ;;  %v16_v6 = vld [vmem:[%s113_s0 + $0x10] sm:$0xff] }
   0x2   :  { %21 = vperm.xlu0 %59, %v18_v1   ;;  %v28_v2 = vld [vmem:[%s112_s2] sm:$0xff]  ;;  %v17_v7 = vld [vmem:[%s113_s0 + $0x18] sm:$0xff] }
   0x3   :  { %v14_v3 = vld [vmem:[%s113_s0] sm:$0xff] }
   0x6   :  { %31 = vperm.xlu0 %59, %v28_v2  }
  0x7d   :  { %v22_v4 = vpop.permute.xlu0 %21 }
  0x7e   :  { %v24_v8 = vmul.f32 %v22_v4, %v14_v3  ;;  %v25_v9 = vmul.f32 %v22_v4, %v15_v5  ;;  %v26_v10 = vmul.f32 %v22_v4, %v16_v6  ;;  %v27_v11 = vmul.f32 %v22_v4, %v17_v7 }
  0x81   :  { %v32_v12 = vpop.permute.xlu0 %31 }
  0x82   :  { %v34_v13 = vadd.f32 %v32_v12, %v24_v8  ;;  %v35_v14 = vadd.f32 %v32_v12, %v25_v9  ;;  %v36_v15 = vadd.f32 %v32_v12, %v26_v10  ;;  %v37_v16 = vadd.f32 %v32_v12, %v27_v11 }
  0x84   :  { %vm38_vm0 = vcmp.ge.f32.partialorder %v34_v13, 0.0  ;;  %vm39_vm1 = vcmp.ge.f32.partialorder %v35_v14, 0.0  ;;  %vm40_vm2 = vcmp.ge.f32.partialorder %v36_v15, 0.0  ;;  %vm41_vm3 = vcmp.ge.f32.partialorder %v37_v16, 0.0 }
  0x85   :  { %v42_v17 = vmul.f32 0.1, %v34_v13  ;;  %v43_v18 = vmul.f32 0.1, %v35_v14  ;;  %v44_v19 = vmul.f32 0.1, %v36_v15 }
  0x86   :  { %v45_v20 = vmul.f32 0.1, %v37_v16 }
  0x87   :  { %v46_v21 = vsel %vm38_vm0, %v34_v13, %v42_v17  ;;  %v47_v22 = vsel %vm39_vm1, %v35_v14, %v43_v18  ;;  %v48_v23 = vsel %vm40_vm2, %v36_v15, %v44_v19 }
  0x88   :  { %v49_v24 = vsel %vm41_vm3, %v37_v16, %v45_v20  ;;  %50 = vst [vmem:[%s114_s3] sm:$0xff] %v46_v21  ;;  %51 = vst [vmem:[%s114_s3 + $0x8] sm:$0xff] %v47_v22 }
  0x89   :  { %52 = vst [vmem:[%s114_s3 + $0x10] sm:$0xff] %v48_v23  ;;  %53 = vst [vmem:[%s114_s3 + $0x18] sm:$0xff] %v49_v24 }

// kernel: darknet_conv_forward.2
= control target key start
LH: loop header
LB: loop body
LE: loop exit
PB: predicated region body
PF: predicated region fallthrough
CT: control target
= control target key end

     0   :  { %vm87_vm0 = vcmask 1041408   ;;  %v253_v2 = vmov 0   ;;  %vm83_vm1 = vcmask 293888   ;;  %vm19_vm2 = vcmask 7168   ;;  %s347_s1 = inlined_call_operand.vmem [shape: bf16[36,512], index: 1, kind: input, shape index: {}]   ;;  %s348_s0 = inlined_call_operand.vmem [shape: bf16[8,36], index: 0, kind: input, shape index: {}]   ;;  %s349_s3 = inlined_call_operand.vmem [shape: f32[8,1], index: 3, kind: output, shape index: {1}]   ;;  %s350_s2 = inlined_call_operand.vmem [shape: f32[8,512], index: 2, kind: output, shape index: {0}]   ;;  %s351_s4 = inlined_call_operand.vmem [shape: f32[8,1], index: 4, kind: output, shape index: {2}]  }
   0x1   :  { %v31_v0 = vld [vmem:[%s347_s1 + $0x40] sm:$0x33]  ;;  %v32_v1 = vld [vmem:[%s347_s1 + $0x48] sm:$0x33]  ;;  %132 = vmatprep.mubr.bf16.mxu0 %v253_v2  ;;  %173 = vmatprep.mubr.bf16.mxu1 %v253_v2  ;;  %v254_v18 = vmov 0.0  }
   0x2   :  { %v228_v3 = vcombine.high %v31_v0, %v31_v0  ;;  %v230_v4 = vcombine.high %v32_v1, %v32_v1  ;;  %v227_v5 = vcombine.low %v31_v0, %v31_v0  ;;  %v229_v6 = vcombine.low %v32_v1, %v32_v1  ;;  %v241_v7 = vld [vmem:[%s347_s1 + $0x24] ss:$16 sps:$4 sm:$0xff]   ;;  %v243_v8 = vld [vmem:[%s347_s1 + $0x2c] ss:$16 sps:$4 sm:$0xff]   ;;  %v245_v11 = vld [vmem:[%s347_s1 + $0x20] ss:$16 sps:$4 sm:$0xff]  }
   0x3   :  { %v246_v12 = vld [vmem:[%s347_s1 + $0x28] ss:$16 sps:$4 sm:$0xff]   ;;  %v247_v13 = vld [vmem:[%s347_s1 + $0x4] ss:$16 sps:$4 sm:$0xff]   ;;  %v249_v14 = vld [vmem:[%s347_s1 + $0xc] ss:$16 sps:$4 sm:$0xff]  }
   0x4   :  { %231 = vmatprep.subr.msk.bf16.mxu0 %vm87_vm0, %v228_v3  ;;  %233 = vmatprep.subr.msk.bf16.mxu1 %vm87_vm0, %v230_v4  ;;  %v89_v9 = vsel %vm87_vm0, %v227_v5, 0  ;;  %v95_v10 = vsel %vm87_vm0, %v229_v6, 0  ;;  %v251_v15 = vld [vmem:[%s347_s1] ss:$16 sps:$4 sm:$0xff]   ;;  %v252_v16 = vld [vmem:[%s347_s1 + $0x8] ss:$16 sps:$4 sm:$0xff]  }
   0x5   :  { %111 = vmatpush1.bf16.msra.mxu0 %v89_v9  ;;  %152 = vmatpush1.bf16.msra.mxu1 %v95_v10  ;;  %v22_v17 = vld [vmem:[%s348_s0] sm:$0xf]  ;;  %20 = vst.msk [vmem:[%s349_s3] sm:$0xff] %vm19_vm2, %v254_v18  ;;  %21 = vst.msk [vmem:[%s351_s4] sm:$0xff] %vm19_vm2, %v254_v18 }
   0x6   :  { %112 = vmatprep.subr.bf16.mxu0 %v241_v7  ;;  %153 = vmatprep.subr.bf16.mxu1 %v243_v8 }
   0x9   :  { %113 = vmatpush1.bf16.msra.mxu0 %v245_v11  ;;  %154 = vmatpush1.bf16.msra.mxu1 %v246_v12 }
   0xa   :  { %114 = vmatprep.subr.bf16.mxu0 %v247_v13  ;;  %155 = vmatprep.subr.bf16.mxu1 %v249_v14 }
   0xc   :  { %v186_v37 = vld [vmem:[%s349_s3] sm:$0xff] }
   0xd   :  { %115 = vmatpush1.bf16.msra.mxu0 %v251_v15  ;;  %156 = vmatpush1.bf16.msra.mxu1 %v252_v16  ;;  %v195_v40 = vld [vmem:[%s351_s4] sm:$0xff] }
  0x10   :  { %232 = vmatmul.mubr.msk.bf16.vlgmr.msra.gmra.mxu0 %vm83_vm1, %v22_v17  ;;  %234 = vmatmul.mubr.msk.bf16.vlgmr.msra.gmra.mxu1 %vm83_vm1, %v22_v17 }
  0xd0   :  { %v134_v19 = vpop.f32.mrf.mxu0  ;;  %v175_v20 = vpop.f32.mrf.mxu1 }
  0xd1   :  { %182 = vst [vmem:[%s350_s2] sm:$0xff] %v134_v19  ;;  %184 = vst [vmem:[%s350_s2 + $0x10] sm:$0xff] %v175_v20  ;;  %v196_v23 = vmul.f32 %v134_v19, %v134_v19  ;;  %v198_v24 = vmul.f32 %v175_v20, %v175_v20 }
  0xd2   :  { %v136_v21 = vpop.f32.mrf.mxu0  ;;  %v177_v22 = vpop.f32.mrf.mxu1 }
  0xd3   :  { %183 = vst [vmem:[%s350_s2 + $0x8] sm:$0xff] %v136_v21  ;;  %v187_v25 = vadd.f32 %v136_v21, %v134_v19  ;;  %v197_v26 = vmul.f32 %v136_v21, %v136_v21  ;;  %185 = vst [vmem:[%s350_s2 + $0x18] sm:$0xff] %v177_v22  ;;  %v199_v35 = vmul.f32 %v177_v22, %v177_v22 }
  0xd4   :  { %v138_v27 = vpop.f32.mrf.mxu0  ;;  %v179_v28 = vpop.f32.mrf.mxu1 }
  0xd5   :  { %v188_v29 = vadd.f32 %v187_v25, %v175_v20  ;;  %v200_v30 = vadd.f32 %v197_v26, %v196_v23 }
  0xd6   :  { %v139_v31 = vpop.f32.mrf.mxu0  ;;  %v180_v32 = vpop.f32.mrf.mxu1 }
  0xd7   :  { %v189_v33 = vadd.f32 %v188_v29, %v177_v22  ;;  %v201_v34 = vadd.f32 %v200_v30, %v198_v24 }
  0xd9   :  { %190 = vadd.xlane.f32.xlu0 %v189_v33  ;;  %v202_v36 = vadd.f32 %v201_v34, %v199_v35 }
  0xdd   :  { %203 = vadd.xlane.f32.xlu0 %v202_v36 }
 0x162   :  { %v191_v38 = vpop.xlane.xlu0 %190 }
 0x163   :  { %v192_v39 = vadd.f32 %v191_v38, %v186_v37 }
 0x165   :  { %194 = vst.msk [vmem:[%s349_s3] sm:$0xff] %vm19_vm2, %v192_v39 }
 0x166   :  { %v204_v41 = vpop.xlane.xlu0 %203 }
 0x167   :  { %v205_v42 = vadd.f32 %v204_v41, %v195_v40 }
 0x169   :  { %206 = vst.msk [vmem:[%s351_s4] sm:$0xff] %vm19_vm2, %v205_v42 }

</bundles_post_ra>
